<compile_context>
chip_gen: v5e
topology: v5e:2x2
jax: 0.10.0
libtpu: 0.0.40
codegen_flags: <defaults>
</compile_context>

<pallas_src>
import jax
import jax.numpy as jnp
from jax.experimental import pallas as pl
from jax.experimental.pallas import tpu as pltpu

LANE = 128
SUBLANE = 8
NEG_BIG = -1e30  # fill for padded logit columns (exp -> 0, never the row max)


def rnn_kernel(xh_ref, wu_ref, bh_ref, v_ref, bv_ref, out_ref, hid_ref):
    # xh_ref : (BM, Kp)   fused [x | h], zero-padded lanes
    # wu_ref : (Kp, Hp)   stacked [W^T ; U^T], zero-padded
    # bh_ref : (1,  Hp)   b_W + b_U, zero-padded
    # v_ref  : (Hp, Op)   V^T, zero-padded
    # bv_ref : (1,  Op)   b_V, padded columns = NEG_BIG
    # out_ref: (BM, Op)   log_softmax(logits)   (padded cols are garbage)
    # hid_ref: (BM, Hp)   tanh pre-activation   (padded cols are 0)

    # Single fused MXU matmul for W(x) + U(h), one bias add.
    pre = jnp.dot(xh_ref[...], wu_ref[...],
                  preferred_element_type=jnp.float32) + bh_ref[...]
    hid = jnp.tanh(pre)                                   # (BM, Hp)

    # output = log_softmax(V(hid)); padded columns carry -1e30 bias so they
    # contribute 0 to the sum and never win the max.
    logits = jnp.dot(hid, v_ref[...],
                     preferred_element_type=jnp.float32) + bv_ref[...]
    m = jnp.max(logits, axis=1, keepdims=True)
    shifted = logits - m
    lse = jnp.log(jnp.sum(jnp.exp(shifted), axis=1, keepdims=True))

    out_ref[...] = (shifted - lse).astype(out_ref.dtype)
    hid_ref[...] = hid.astype(hid_ref.dtype)


def _round_up(n, m):
    return pl.cdiv(n, m) * m


def rnn_forward(x, h, W_w, W_b, U_w, U_b, V_w, V_b):
    """x: (B, I), h: (B, I); weights in PyTorch convention (out, in)."""
    B, I = x.shape
    H = W_w.shape[0]
    O = V_w.shape[0]

    # Lane-dense padded sizes.
    Kp = max(LANE, _round_up(2 * I, LANE))
    Hp = max(LANE, _round_up(H, LANE))
    Op = max(LANE, _round_up(O, LANE))

    # Batch tiling: one sublane-aligned block for small B, 128-row blocks
    # (parallel grid axis -> both TCs on v7x) for large B.
    if B >= 128:
        BM = 128
    else:
        BM = max(SUBLANE, _round_up(B, SUBLANE))
    Bp = _round_up(B, BM)
    grid = (Bp // BM,)

    f32 = jnp.float32

    # Fused, padded operands (all wrapper-side XLA ops, done once per call).
    xh = jnp.concatenate([x, h], axis=1).astype(f32)                 # (B, 2I)
    xh = jnp.pad(xh, ((0, Bp - B), (0, Kp - 2 * I)))                 # (Bp, Kp)

    WU = jnp.concatenate([W_w.T, U_w.T], axis=0).astype(f32)         # (2I, H)
    WU = jnp.pad(WU, ((0, Kp - 2 * I), (0, Hp - H)))                 # (Kp, Hp)
    bh = jnp.pad((W_b + U_b).reshape(1, H).astype(f32),
                 ((0, 0), (0, Hp - H)))                              # (1, Hp)

    Vt = jnp.pad(V_w.T.astype(f32), ((0, Hp - H), (0, Op - O)))      # (Hp, Op)
    bv = jnp.pad(V_b.reshape(1, O).astype(f32),
                 ((0, 0), (0, Op - O)), constant_values=NEG_BIG)     # (1, Op)

    out_p, hid_p = pl.pallas_call(
        rnn_kernel,
        out_shape=(
            jax.ShapeDtypeStruct((Bp, Op), f32),
            jax.ShapeDtypeStruct((Bp, Hp), f32),
        ),
        grid=grid,
        in_specs=[
            pl.BlockSpec((BM, Kp), lambda i: (i, 0)),   # [x | h]
            pl.BlockSpec((Kp, Hp), lambda i: (0, 0)),   # [W^T ; U^T]
            pl.BlockSpec((1, Hp), lambda i: (0, 0)),    # b_W + b_U
            pl.BlockSpec((Hp, Op), lambda i: (0, 0)),   # V^T
            pl.BlockSpec((1, Op), lambda i: (0, 0)),    # b_V (padded: -1e30)
        ],
        out_specs=(
            pl.BlockSpec((BM, Op), lambda i: (i, 0)),
            pl.BlockSpec((BM, Hp), lambda i: (i, 0)),
        ),
        compiler_params=pltpu.CompilerParams(
            dimension_semantics=("parallel",)),
    )(xh, WU, bh, Vt, bv)

    # Strip padding.
    return out_p[:B, :O], hid_p[:B, :H]


def _ref_forward(x, h, W_w, W_b, U_w, U_b, V_w, V_b):
    hid = jnp.tanh(x @ W_w.T + W_b + h @ U_w.T + U_b)
    logits = hid @ V_w.T + V_b
    out = jax.nn.log_softmax(logits, axis=1)
    return out, hid


if __name__ == "__main__":
    # Small shapes consistent with the module (Linear layers on 2D inputs).
    B = 8             # batch
    input_size = 32   # I  (hidden state fed back in is also width I, per module)
    hidden_size = 32  # H
    output_size = 16  # O

    key = jax.random.PRNGKey(0)
    keys = jax.random.split(key, 8)

    # Deterministic parameter init (PyTorch-Linear-style uniform bounds).
    def uinit(k, shape, fan_in):
        bound = 1.0 / (fan_in ** 0.5)
        return jax.random.uniform(k, shape, jnp.float32, -bound, bound)

    W_w = uinit(keys[0], (hidden_size, input_size), input_size)
    W_b = uinit(keys[1], (hidden_size,), input_size)
    U_w = uinit(keys[2], (hidden_size, input_size), input_size)
    U_b = uinit(keys[3], (hidden_size,), input_size)
    V_w = uinit(keys[4], (output_size, hidden_size), hidden_size)
    V_b = uinit(keys[5], (output_size,), hidden_size)

    x = jax.random.normal(keys[6], (B, input_size), jnp.float32)
    h = jax.random.normal(keys[7], (B, input_size), jnp.float32)

    out, hid = rnn_forward(x, h, W_w, W_b, U_w, U_b, V_w, V_b)
    jax.block_until_ready((out, hid))

    out_ref, hid_ref = _ref_forward(x, h, W_w, W_b, U_w, U_b, V_w, V_b)
    assert out.shape == (B, output_size) and hid.shape == (B, hidden_size)
    assert jnp.allclose(out, out_ref, atol=2e-5, rtol=1e-5)
    assert jnp.allclose(hid, hid_ref, atol=2e-5, rtol=1e-5)

    print("KERNEL_OK")
</pallas_src>

<mosaic_0001>
module attributes {stable_mosaic.version = 11 : i64} {
  func.func @rnn_kernel(%arg0: i32, %arg1: memref<8x128xf32, #tpu.memory_space<vmem>>, %arg2: memref<128x128xf32, #tpu.memory_space<vmem>>, %arg3: memref<1x128xf32, #tpu.memory_space<vmem>>, %arg4: memref<128x128xf32, #tpu.memory_space<vmem>>, %arg5: memref<1x128xf32, #tpu.memory_space<vmem>>, %arg6: memref<8x128xf32, #tpu.memory_space<vmem>>, %arg7: memref<8x128xf32, #tpu.memory_space<vmem>>) attributes {dimension_semantics = [#tpu.dimension_semantics<parallel>], iteration_bounds = array<i64: 1>, scalar_prefetch = 0 : i64, scratch_operands = 0 : i64, tpu.core_type = #tpu.core_type<tc>, window_params = [{transform_indices = @transform_0, window_bounds = array<i64: 8, 128>}, {pipeline_mode = #tpu.pipeline_mode<synchronous>, transform_indices = @transform_1, window_bounds = array<i64: 128, 128>}, {pipeline_mode = #tpu.pipeline_mode<synchronous>, transform_indices = @transform_2, window_bounds = array<i64: 1, 128>}, {pipeline_mode = #tpu.pipeline_mode<synchronous>, transform_indices = @transform_3, window_bounds = array<i64: 128, 128>}, {pipeline_mode = #tpu.pipeline_mode<synchronous>, transform_indices = @transform_4, window_bounds = array<i64: 1, 128>}, {transform_indices = @transform_5, window_bounds = array<i64: 8, 128>}, {transform_indices = @transform_6, window_bounds = array<i64: 8, 128>}]} {
    %c0 = arith.constant 0 : index
    %c0_0 = arith.constant 0 : index
    %0 = vector.load %arg1[%c0, %c0_0] : memref<8x128xf32, #tpu.memory_space<vmem>>, vector<8x128xf32>
    %c0_1 = arith.constant 0 : index
    %c0_2 = arith.constant 0 : index
    %1 = vector.load %arg2[%c0_1, %c0_2] : memref<128x128xf32, #tpu.memory_space<vmem>>, vector<128x128xf32>
    %cst = arith.constant dense<0.000000e+00> : vector<8x128xf32>
    %2 = tpu.matmul %0, %1, %cst {dimension_numbers = #tpu.dot_dimension_numbers<[1], [0], [0], [1], [0, 0, 1, 1], [], []>} : vector<8x128xf32>, vector<128x128xf32>, vector<8x128xf32> -> vector<8x128xf32>
    %c0_3 = arith.constant 0 : index
    %c0_4 = arith.constant 0 : index
    %3 = vector.load %arg3[%c0_3, %c0_4] : memref<1x128xf32, #tpu.memory_space<vmem>>, vector<1x128xf32>
    %4 = vector.broadcast %3 : vector<1x128xf32> to vector<8x128xf32>
    %5 = arith.addf %2, %4 : vector<8x128xf32>
    %6 = math.tanh %5 : vector<8x128xf32>
    %c0_5 = arith.constant 0 : index
    %c0_6 = arith.constant 0 : index
    %7 = vector.load %arg4[%c0_5, %c0_6] : memref<128x128xf32, #tpu.memory_space<vmem>>, vector<128x128xf32>
    %cst_7 = arith.constant dense<0.000000e+00> : vector<8x128xf32>
    %8 = tpu.matmul %6, %7, %cst_7 {dimension_numbers = #tpu.dot_dimension_numbers<[1], [0], [0], [1], [0, 0, 1, 1], [], []>} : vector<8x128xf32>, vector<128x128xf32>, vector<8x128xf32> -> vector<8x128xf32>
    %c0_8 = arith.constant 0 : index
    %c0_9 = arith.constant 0 : index
    %9 = vector.load %arg5[%c0_8, %c0_9] : memref<1x128xf32, #tpu.memory_space<vmem>>, vector<1x128xf32>
    %10 = vector.broadcast %9 : vector<1x128xf32> to vector<8x128xf32>
    %11 = arith.addf %8, %10 : vector<8x128xf32>
    %cst_10 = arith.constant dense<0xFF800000> : vector<8xf32>
    %12 = vector.multi_reduction <maximumf>, %11, %cst_10 [1] : vector<8x128xf32> to vector<8xf32>
    %13 = vector.shape_cast %12 : vector<8xf32> to vector<8x1xf32>
    %14 = vector.broadcast %13 : vector<8x1xf32> to vector<8x128xf32>
    %15 = arith.subf %11, %14 : vector<8x128xf32>
    %16 = math.exp %15 : vector<8x128xf32>
    %cst_11 = arith.constant dense<0.000000e+00> : vector<8xf32>
    %17 = vector.multi_reduction <add>, %16, %cst_11 [1] : vector<8x128xf32> to vector<8xf32>
    %18 = vector.shape_cast %17 : vector<8xf32> to vector<8x1xf32>
    %19 = math.log %18 : vector<8x1xf32>
    %20 = vector.broadcast %19 : vector<8x1xf32> to vector<8x128xf32>
    %21 = arith.subf %15, %20 : vector<8x128xf32>
    %c0_12 = arith.constant 0 : index
    %c0_13 = arith.constant 0 : index
    %22 = vector.load %arg6[%c0_12, %c0_13] : memref<8x128xf32, #tpu.memory_space<vmem>>, vector<8x128xf32>
    tpu.vector_store %arg6[%c0_12, %c0_13], %21 {strides = array<i32>} : memref<8x128xf32, #tpu.memory_space<vmem>>, vector<8x128xf32>,
    %c0_14 = arith.constant 0 : index
    %c0_15 = arith.constant 0 : index
    %23 = vector.load %arg7[%c0_14, %c0_15] : memref<8x128xf32, #tpu.memory_space<vmem>>, vector<8x128xf32>
    tpu.vector_store %arg7[%c0_14, %c0_15], %6 {strides = array<i32>} : memref<8x128xf32, #tpu.memory_space<vmem>>, vector<8x128xf32>,
    return
  }
  func.func @transform_0(%arg0: i32) -> (i32, i32) {
    %c0_i32 = arith.constant 0 : i32
    %c0_i32_0 = arith.constant 0 : i32
    return %arg0, %c0_i32 : i32, i32
  }
  func.func @transform_1(%arg0: i32) -> (i32, i32) {
    %c0_i32 = arith.constant 0 : i32
    %c0_i32_0 = arith.constant 0 : i32
    %c0_i32_1 = arith.constant 0 : i32
    return %c0_i32, %c0_i32_0 : i32, i32
  }
  func.func @transform_2(%arg0: i32) -> (i32, i32) {
    %c0_i32 = arith.constant 0 : i32
    %c0_i32_0 = arith.constant 0 : i32
    %c0_i32_1 = arith.constant 0 : i32
    return %c0_i32, %c0_i32_0 : i32, i32
  }
  func.func @transform_3(%arg0: i32) -> (i32, i32) {
    %c0_i32 = arith.constant 0 : i32
    %c0_i32_0 = arith.constant 0 : i32
    %c0_i32_1 = arith.constant 0 : i32
    return %c0_i32, %c0_i32_0 : i32, i32
  }
  func.func @transform_4(%arg0: i32) -> (i32, i32) {
    %c0_i32 = arith.constant 0 : i32
    %c0_i32_0 = arith.constant 0 : i32
    %c0_i32_1 = arith.constant 0 : i32
    return %c0_i32, %c0_i32_0 : i32, i32
  }
  func.func @transform_5(%arg0: i32) -> (i32, i32) {
    %c0_i32 = arith.constant 0 : i32
    %c0_i32_0 = arith.constant 0 : i32
    return %arg0, %c0_i32 : i32, i32
  }
  func.func @transform_6(%arg0: i32) -> (i32, i32) {
    %c0_i32 = arith.constant 0 : i32
    %c0_i32_0 = arith.constant 0 : i32
    return %arg0, %c0_i32 : i32, i32
  }
}

</mosaic_0001>

<bundles_post_ra>
// kernel: tpu_custom_call.1
= control target key start
LH: loop header
LB: loop body
LE: loop exit
PB: predicated region body
PF: predicated region fallthrough
CT: control target
= control target key end

     0   :  { %12 = vsyncpa [#allocation3], 0  ;;  %s403_s0 = inlined_call_operand.hbm [shape: f32[8,128], index: 0, kind: input, shape index: {}]   ;;  %s404_s1 = inlined_call_operand.hbm [shape: f32[128,128], index: 1, kind: input, shape index: {}]   ;;  %s405_s2 = inlined_call_operand.vmem [shape: f32[1,128], index: 2, kind: input, shape index: {}]   ;;  %s406_s3 = inlined_call_operand.hbm [shape: f32[128,128], index: 3, kind: input, shape index: {}]   ;;  %s407_s4 = inlined_call_operand.vmem [shape: f32[1,128], index: 4, kind: input, shape index: {}]   ;;  %s408_s5 = inlined_call_operand.hbm [shape: f32[8,128], index: 5, kind: output, shape index: {0}]   ;;  %s409_s6 = inlined_call_operand.hbm [shape: f32[8,128], index: 6, kind: output, shape index: {1}]  }
   0x1   :  { %13 = vsyncpa [#allocation6], 0 }
   0x2   :  { %14 = vsyncpa [#allocation4], 0  ;;  %s31_s23 = sshll.u32 %s404_s1, 4  ;;  %s32_s23 = int_to_ptr.hbm [resolvable:$true] %s31_s23 }
   0x3   :  { %15 = vsyncpa [#allocation10], 0  ;;  %s340_s24 = smov [#allocation5]   ;;  %s21_s28 = sshll.u32 %s403_s0, 4  ;;  %s22_s28 = int_to_ptr.hbm [resolvable:$true] %s21_s28 }
   0x4   :  { %s33_s25 = sshll.u32 %s340_s24, 4  ;;  %s341_s29 = smov 128   ;;  %s34_s25 = int_to_ptr.vmem [resolvable:$true] %s33_s25 }
   0x5   :  { %s342_s30 = smov 8   ;;  %s343_s7 = smov [#allocation2]  }
   0x6   :  { %39 = dma.hbm_to_vmem [thread:$0]  %s32_s23, 2048, %s34_s25, [#allocation6], %s341_s29, %s341_s29, %s342_s30  }
   0x7   :  { %s23_s8 = sshll.u32 %s343_s7, 4  ;;  %s46_s11 = sshll.u32 %s406_s3, 4  ;;  %s24_s8 = int_to_ptr.vmem [resolvable:$true] %s23_s8  ;;  %s47_s11 = int_to_ptr.hbm [resolvable:$true] %s46_s11 }
   0x8   :  { %26 = dma.hbm_to_vmem [thread:$0]  %s22_s28, 128, %s24_s8, [#allocation3]  }
   0x9   :  { %s344_s1 = smov [#allocation7]  }
   0xa   :  { %s48_s12 = sshll.u32 %s344_s1, 4  ;;  %s49_s12 = int_to_ptr.vmem [resolvable:$true] %s48_s12 }
   0xb   :  { %54 = dma.hbm_to_vmem [thread:$0]  %s47_s11, 2048, %s49_s12, [#allocation6], %s341_s29, %s341_s29, %s342_s30  }
   0xc   :  { %332 = dma.done.wait [#allocation3], 128  }
   0xd   :  { %333 = vsyncadd [#allocation3], 4294967168 }
   0xe   :  { %334 = dma.done.wait [#allocation6], 4096  }
   0xf   :  { %335 = vsyncadd [#allocation6], 4294963200  ;;  %v85_v0 = vld [vmem:[#allocation5 + $0x78] sm:$0xff]  ;;  %v84_v1 = vld [vmem:[#allocation5 + $0x70] sm:$0xff]  ;;  %s181_s18 = sshll.u32 %s409_s6, 4  ;;  %s170_s22 = sshll.u32 %s408_s5, 4  ;;  %s182_s18 = int_to_ptr.hbm [resolvable:$true] %s181_s18  ;;  %s171_s22 = int_to_ptr.hbm [resolvable:$true] %s170_s22 }
  0x10   :  { %90 = vmatpush.msra.mxu0 %v85_v0  ;;  %v83_v2 = vld [vmem:[#allocation5 + $0x68] sm:$0xff]  ;;  %v82_v3 = vld [vmem:[#allocation5 + $0x60] sm:$0xff]  ;;  %v126_v4 = vld [vmem:[#allocation7 + $0x78] sm:$0xff] }
  0x11   :  { %v81_v5 = vld [vmem:[#allocation5 + $0x58] sm:$0xff]  ;;  %131 = vmatpush.msra.mxu1 %v126_v4  ;;  %v125_v6 = vld [vmem:[#allocation7 + $0x70] sm:$0xff]  ;;  %v124_v7 = vld [vmem:[#allocation7 + $0x68] sm:$0xff] }
  0x12   :  { %91 = vmatpush.msra.mxu0 %v84_v1  ;;  %v80_v8 = vld [vmem:[#allocation5 + $0x50] sm:$0xff]  ;;  %v123_v9 = vld [vmem:[#allocation7 + $0x60] sm:$0xff]  ;;  %v79_v10 = vld [vmem:[#allocation5 + $0x48] sm:$0xff] }
  0x13   :  { %132 = vmatpush.msra.mxu1 %v125_v6  ;;  %v122_v11 = vld [vmem:[#allocation7 + $0x58] sm:$0xff]  ;;  %v78_v12 = vld [vmem:[#allocation5 + $0x40] sm:$0xff]  ;;  %v121_v13 = vld [vmem:[#allocation7 + $0x50] sm:$0xff] }
  0x14   :  { %92 = vmatpush.msra.mxu0 %v83_v2  ;;  %v77_v14 = vld [vmem:[#allocation5 + $0x38] sm:$0xff]  ;;  %v120_v15 = vld [vmem:[#allocation7 + $0x48] sm:$0xff]  ;;  %v76_v16 = vld [vmem:[#allocation5 + $0x30] sm:$0xff] }
  0x15   :  { %133 = vmatpush.msra.mxu1 %v124_v7  ;;  %v119_v17 = vld [vmem:[#allocation7 + $0x40] sm:$0xff]  ;;  %v75_v18 = vld [vmem:[#allocation5 + $0x28] sm:$0xff]  ;;  %v118_v19 = vld [vmem:[#allocation7 + $0x38] sm:$0xff] }
  0x16   :  { %93 = vmatpush.msra.mxu0 %v82_v3  ;;  %v74_v20 = vld [vmem:[#allocation5 + $0x20] sm:$0xff]  ;;  %v117_v21 = vld [vmem:[#allocation7 + $0x30] sm:$0xff]  ;;  %v73_v22 = vld [vmem:[#allocation5 + $0x18] sm:$0xff] }
  0x17   :  { %134 = vmatpush.msra.mxu1 %v123_v9  ;;  %v116_v23 = vld [vmem:[#allocation7 + $0x28] sm:$0xff]  ;;  %v72_v24 = vld [vmem:[#allocation5 + $0x10] sm:$0xff]  ;;  %v70_v26 = vld [vmem:[#allocation5] sm:$0xff] }
  0x18   :  { %94 = vmatpush.msra.mxu0 %v81_v5  ;;  %v71_v25 = vld [vmem:[#allocation5 + $0x8] sm:$0xff]  ;;  %v69_v27 = vld [vmem:[#allocation2] sm:$0xff]  ;;  %v115_v28 = vld [vmem:[#allocation7 + $0x20] sm:$0xff] }
  0x19   :  { %135 = vmatpush.msra.mxu1 %v122_v11  ;;  %v114_v29 = vld [vmem:[#allocation7 + $0x18] sm:$0xff]  ;;  %v113_v30 = vld [vmem:[#allocation7 + $0x10] sm:$0xff]  ;;  %v112_v31 = vld [vmem:[#allocation7 + $0x8] sm:$0xff] }
  0x1a   :  { %95 = vmatpush.msra.mxu0 %v80_v8  ;;  %v111_v32 = vld [vmem:[#allocation7] sm:$0xff]  ;;  %v204_v33 = vld [vmem:[%s405_s2] ss:$0 sm:$0xff]  ;;  %s345_s2 = smov [#allocation9]  }
  0x1b   :  { %136 = vmatpush.msra.mxu1 %v121_v13  ;;  %v205_v37 = vld [vmem:[%s407_s4] ss:$0 sm:$0xff]  ;;  %s179_s15 = sshll.u32 %s345_s2, 4  ;;  %s346_s4 = smov [#allocation8]   ;;  %s180_s15 = int_to_ptr.vmem [resolvable:$true] %s179_s15 }
  0x1c   :  { %96 = vmatpush.msra.mxu0 %v79_v10  ;;  %s168_s19 = sshll.u32 %s346_s4, 4  ;;  %s169_s19 = int_to_ptr.vmem [resolvable:$true] %s168_s19 }
  0x1d   :  { %137 = vmatpush.msra.mxu1 %v120_v15 }
  0x1e   :  { %97 = vmatpush.msra.mxu0 %v78_v12 }
  0x1f   :  { %138 = vmatpush.msra.mxu1 %v119_v17 }
  0x20   :  { %98 = vmatpush.msra.mxu0 %v77_v14 }
  0x21   :  { %139 = vmatpush.msra.mxu1 %v118_v19 }
  0x22   :  { %99 = vmatpush.msra.mxu0 %v76_v16 }
  0x23   :  { %140 = vmatpush.msra.mxu1 %v117_v21 }
  0x24   :  { %100 = vmatpush.msra.mxu0 %v75_v18 }
  0x25   :  { %141 = vmatpush.msra.mxu1 %v116_v23 }
  0x26   :  { %101 = vmatpush.msra.mxu0 %v74_v20 }
  0x27   :  { %142 = vmatpush.msra.mxu1 %v115_v28 }
  0x28   :  { %102 = vmatpush.msra.mxu0 %v73_v22 }
  0x29   :  { %143 = vmatpush.msra.mxu1 %v114_v29 }
  0x2a   :  { %103 = vmatpush.msra.mxu0 %v72_v24 }
  0x2b   :  { %144 = vmatpush.msra.mxu1 %v113_v30 }
  0x2c   :  { %104 = vmatpush.msra.mxu0 %v71_v25 }
  0x2d   :  { %145 = vmatpush.msra.mxu1 %v112_v31 }
  0x2e   :  { %105 = vmatpush.msra.mxu0 %v70_v26 }
  0x2f   :  { %106 = vmatmul.f32.vlgmr.msra.gmra.mxu0 %v69_v27  ;;  %146 = vmatpush.msra.mxu1 %v111_v32 }
  0xac   :  { %v107_v34 = vpop.f32.mrf.mxu0 }
  0xad   :  { %v108_v35 = vadd.f32 %v204_v33, %v107_v34 }
  0xaf   :  { %206 = vtanh.f32 %v108_v35 }
  0xb5   :  { %v207_v36 = vpop.eup %206 }
  0xb6   :  { %162 = vst [vmem:[#allocation9] sm:$0xff] %v207_v36  ;;  %147 = vmatmul.f32.vlgmr.msra.gmra.mxu1 %v207_v36 }
  0xb7   :  { %184 = dma.vmem_to_hbm [thread:$0]  %s180_s15, 128, %s182_s18, [#allocation10]  }
 0x133   :  { %v148_v38 = vpop.f32.mrf.mxu1 }
 0x134   :  { %v149_v39 = vadd.f32 %v205_v37, %v148_v38 }
 0x136   :  { %151 = vmax.xlane.f32.xlu0 %v149_v39 }
 0x1a9   :  { %v152_v40 = vpop.xlane.xlu0 %151 }
 0x1aa   :  { %v153_v41 = vsub.f32 %v149_v39, %v152_v40 }
 0x1ac   :  { %v154_v42 = vmul.f32 1.442695, %v153_v41 }
 0x1ae   :  { %208 = vpow2.f32 %v154_v42 }
 0x1b4   :  { %v209_v43 = vpop.eup %208 }
 0x1b5   :  { %156 = vadd.xlane.f32.xlu0 %v209_v43 }
 0x228   :  { %v157_v44 = vpop.xlane.xlu0 %156 }
 0x229   :  { %210 = vlog2.f32 %v157_v44 }
 0x22f   :  { %v211_v45 = vpop.eup %210 }
 0x230   :  { %v159_v46 = vmul.f32 0.6931472, %v211_v45 }
 0x232   :  { %v160_v47 = vsub.f32 %v153_v41, %v159_v46 }
 0x234   :  { %161 = vst [vmem:[#allocation8] sm:$0xff] %v160_v47 }
 0x235   :  { %173 = dma.vmem_to_hbm [thread:$0]  %s169_s19, 128, %s171_s22, [#allocation4]  }
 0x236   :  { %336 = dma.done.wait [#allocation4], 128  }
 0x237   :  { %337 = vsyncadd [#allocation4], 4294967168 }
 0x238   :  { %338 = dma.done.wait [#allocation10], 128  }
 0x239   :  { %339 = vsyncadd [#allocation10], 4294967168 }
 0x23a   :  { %193 = vsyncpa [#allocation3], 1 }
 0x23b   :  { %194 = vsyncpa [#allocation6], 1 }
 0x23c   :  { %195 = vsyncpa [#allocation4], 1 }
 0x23d   :  { %196 = vsyncpa [#allocation10], 1 }

</bundles_post_ra>
